<compile_context>
chip_gen: v7x
topology: tpu7x:2x2x1
jax: 0.10.0
libtpu: 0.0.40
codegen_flags: <defaults>
</compile_context>

<pallas_src>
import jax
import jax.numpy as jnp
from jax.experimental import pallas as pl
from jax.experimental.pallas import tpu as pltpu


def _head_kernel(x_ref, w1_ref, b1_ref, w2_ref, b2_ref, w3_ref, b3_ref, o_ref):
    # x_ref: (TB, V) -- the selected token's features for this batch tile
    x = x_ref[...]

    h = jnp.dot(x, w1_ref[...], preferred_element_type=jnp.float32) + b1_ref[...]
    h = jnp.where(h > 0, h, 0.01 * h)                      # LeakyReLU (slope 0.01)

    m = jnp.dot(h, w2_ref[...], preferred_element_type=jnp.float32) + b2_ref[...]
    m = jnp.where(m > 0, m, 0.01 * m)                      # LeakyReLU (slope 0.01)

    y = jnp.dot(m, w3_ref[...], preferred_element_type=jnp.float32) + b3_ref[...]
    o_ref[...] = y.astype(o_ref.dtype)


def encoder_model_head(bert_out, params, p=0):
    """Fused POS(p) + Encod_Last_Layers (mtl=False, ret_vec=False) forward.

    bert_out: (B, S, V) transformer last_hidden_state.
    params:   (w1 (V,H), b1 (H,), w2 (H,90), b2 (90,), w3 (90,2), b3 (2,))
    """
    B, S, V = bert_out.shape
    w1, b1, w2, b2, w3, b3 = params
    H = w1.shape[1]
    MID = w2.shape[1]
    NOUT = w3.shape[1]
    assert 0 <= p < S

    # Free, contiguous reshape: token p of batch row b occupies columns
    # [p*V, (p+1)*V) of row b, i.e. a lane-dense rectangular block that the
    # index_map can address directly (only that slab is DMA'd from HBM).
    x2 = bert_out.reshape(B, S * V)
    b1r = b1.reshape(1, H)
    b2r = b2.reshape(1, MID)
    b3r = b3.reshape(1, NOUT)

    # Batch tile: full batch for small B (block == full dim), otherwise
    # 256-row tiles (multiple of 8 sublanes).  Per-tile VMEM is at most
    # 256*V*4 B (~0.75 MiB for V=768) + weights (<0.5 MiB), comfortably under
    # the scoped-VMEM defaults on v5e / v6e / v7x even with double-buffering.
    tb = B if B <= 256 else 256
    grid = (pl.cdiv(B, tb),)

    out = pl.pallas_call(
        _head_kernel,
        out_shape=jax.ShapeDtypeStruct((B, NOUT), bert_out.dtype),
        grid_spec=pltpu.PrefetchScalarGridSpec(
            num_scalar_prefetch=0,
            grid=grid,
            in_specs=[
                # Only the p-th V-wide slab of each batch tile is transferred.
                pl.BlockSpec((tb, V), lambda i: (i, p)),
                # Weights/biases: full blocks, resident across grid steps.
                pl.BlockSpec((V, H), lambda i: (0, 0)),
                pl.BlockSpec((1, H), lambda i: (0, 0)),
                pl.BlockSpec((H, MID), lambda i: (0, 0)),
                pl.BlockSpec((1, MID), lambda i: (0, 0)),
                pl.BlockSpec((MID, NOUT), lambda i: (0, 0)),
                pl.BlockSpec((1, NOUT), lambda i: (0, 0)),
            ],
            out_specs=pl.BlockSpec((tb, NOUT), lambda i: (i, 0)),
        ),
        compiler_params=pltpu.CompilerParams(
            dimension_semantics=("parallel",),
        ),
    )(x2, w1, b1r, w2, b2r, w3, b3r)

    # Matches PyTorch's `.squeeze()` on the Task1 output.
    return jnp.squeeze(out)


if __name__ == "__main__":
    key = jax.random.PRNGKey(0)
    kx, k1, k2, k3, k4, k5, k6 = jax.random.split(key, 7)

    # Small shapes implied by the forward: batch=2, seq=8, vec_size=768 (BERT
    # hidden), hidden_size=128, FIXED_REP_SIZE=90, Task1 out=2.
    B, S, V = 2, 8, 768
    H, MID, NOUT = 128, 90, 2
    P = 0  # selection='first' -> POS(0)

    bert_out = jax.random.normal(kx, (B, S, V), dtype=jnp.float32)
    w1 = jax.random.normal(k1, (V, H), jnp.float32) / jnp.sqrt(V)
    b1 = jax.random.normal(k2, (H,), jnp.float32) * 0.01
    w2 = jax.random.normal(k3, (H, MID), jnp.float32) / jnp.sqrt(H)
    b2 = jax.random.normal(k4, (MID,), jnp.float32) * 0.01
    w3 = jax.random.normal(k5, (MID, NOUT), jnp.float32) / jnp.sqrt(MID)
    b3 = jax.random.normal(k6, (NOUT,), jnp.float32) * 0.01

    out = encoder_model_head(bert_out, (w1, b1, w2, b2, w3, b3), p=P)
    out = jax.block_until_ready(out)

    # Plain-JAX reference of the same post-BERT forward pass.
    def leaky(x):
        return jnp.where(x > 0, x, 0.01 * x)

    v = bert_out[:, P, :]
    h = leaky(v @ w1 + b1)
    m = leaky(h @ w2 + b2)
    ref = jnp.squeeze(m @ w3 + b3)

    assert out.shape == ref.shape == (B, NOUT)
    assert jnp.allclose(out, ref, atol=1e-2, rtol=1e-2), "Pallas head mismatch vs reference"

    print("KERNEL_OK")
</pallas_src>

<mosaic_0001>
module attributes {stable_mosaic.version = 11 : i64} {
  func.func @_head_kernel(%arg0: i32, %arg1: memref<2x768xf32, #tpu.memory_space<vmem>>, %arg2: memref<768x128xf32, #tpu.memory_space<vmem>>, %arg3: memref<1x128xf32, #tpu.memory_space<vmem>>, %arg4: memref<128x90xf32, #tpu.memory_space<vmem>>, %arg5: memref<1x90xf32, #tpu.memory_space<vmem>>, %arg6: memref<90x2xf32, #tpu.memory_space<vmem>>, %arg7: memref<1x2xf32, #tpu.memory_space<vmem>>, %arg8: memref<2x2xf32, #tpu.memory_space<vmem>>) attributes {dimension_semantics = [#tpu.dimension_semantics<parallel>], iteration_bounds = array<i64: 1>, scalar_prefetch = 0 : i64, scratch_operands = 0 : i64, tpu.core_type = #tpu.core_type<tc>, window_params = [{transform_indices = @transform_0, window_bounds = array<i64: 2, 768>}, {pipeline_mode = #tpu.pipeline_mode<synchronous>, transform_indices = @transform_1, window_bounds = array<i64: 768, 128>}, {pipeline_mode = #tpu.pipeline_mode<synchronous>, transform_indices = @transform_2, window_bounds = array<i64: 1, 128>}, {pipeline_mode = #tpu.pipeline_mode<synchronous>, transform_indices = @transform_3, window_bounds = array<i64: 128, 90>}, {pipeline_mode = #tpu.pipeline_mode<synchronous>, transform_indices = @transform_4, window_bounds = array<i64: 1, 90>}, {pipeline_mode = #tpu.pipeline_mode<synchronous>, transform_indices = @transform_5, window_bounds = array<i64: 90, 2>}, {pipeline_mode = #tpu.pipeline_mode<synchronous>, transform_indices = @transform_6, window_bounds = array<i64: 1, 2>}, {transform_indices = @transform_7, window_bounds = array<i64: 2, 2>}]} {
    %c0 = arith.constant 0 : index
    %c0_0 = arith.constant 0 : index
    %0 = vector.load %arg1[%c0, %c0_0] : memref<2x768xf32, #tpu.memory_space<vmem>>, vector<2x768xf32>
    %c0_1 = arith.constant 0 : index
    %c0_2 = arith.constant 0 : index
    %1 = vector.load %arg2[%c0_1, %c0_2] : memref<768x128xf32, #tpu.memory_space<vmem>>, vector<768x128xf32>
    %cst = arith.constant dense<0.000000e+00> : vector<2x128xf32>
    %2 = tpu.matmul %0, %1, %cst {dimension_numbers = #tpu.dot_dimension_numbers<[1], [0], [0], [1], [0, 0, 1, 1], [], []>} : vector<2x768xf32>, vector<768x128xf32>, vector<2x128xf32> -> vector<2x128xf32>
    %c0_3 = arith.constant 0 : index
    %c0_4 = arith.constant 0 : index
    %3 = vector.load %arg3[%c0_3, %c0_4] : memref<1x128xf32, #tpu.memory_space<vmem>>, vector<1x128xf32>
    %4 = vector.broadcast %3 : vector<1x128xf32> to vector<2x128xf32>
    %5 = arith.addf %2, %4 : vector<2x128xf32>
    %cst_5 = arith.constant 0.000000e+00 : f32
    %6 = vector.broadcast %cst_5 : f32 to vector<2x128xf32>
    %7 = arith.cmpf ogt, %5, %6 : vector<2x128xf32>
    %cst_6 = arith.constant 0.00999999977 : f32
    %8 = vector.broadcast %cst_6 : f32 to vector<2x128xf32>
    %9 = arith.mulf %8, %5 : vector<2x128xf32>
    %10 = arith.select %7, %5, %9 : vector<2x128xi1>, vector<2x128xf32>
    %c0_7 = arith.constant 0 : index
    %c0_8 = arith.constant 0 : index
    %11 = vector.load %arg4[%c0_7, %c0_8] : memref<128x90xf32, #tpu.memory_space<vmem>>, vector<128x90xf32>
    %cst_9 = arith.constant dense<0.000000e+00> : vector<2x90xf32>
    %12 = tpu.matmul %10, %11, %cst_9 {dimension_numbers = #tpu.dot_dimension_numbers<[1], [0], [0], [1], [0, 0, 1, 1], [], []>} : vector<2x128xf32>, vector<128x90xf32>, vector<2x90xf32> -> vector<2x90xf32>
    %c0_10 = arith.constant 0 : index
    %c0_11 = arith.constant 0 : index
    %13 = vector.load %arg5[%c0_10, %c0_11] : memref<1x90xf32, #tpu.memory_space<vmem>>, vector<1x90xf32>
    %14 = vector.broadcast %13 : vector<1x90xf32> to vector<2x90xf32>
    %15 = arith.addf %12, %14 : vector<2x90xf32>
    %cst_12 = arith.constant 0.000000e+00 : f32
    %16 = vector.broadcast %cst_12 : f32 to vector<2x90xf32>
    %17 = arith.cmpf ogt, %15, %16 : vector<2x90xf32>
    %cst_13 = arith.constant 0.00999999977 : f32
    %18 = vector.broadcast %cst_13 : f32 to vector<2x90xf32>
    %19 = arith.mulf %18, %15 : vector<2x90xf32>
    %20 = arith.select %17, %15, %19 : vector<2x90xi1>, vector<2x90xf32>
    %c0_14 = arith.constant 0 : index
    %c0_15 = arith.constant 0 : index
    %21 = vector.load %arg6[%c0_14, %c0_15] : memref<90x2xf32, #tpu.memory_space<vmem>>, vector<90x2xf32>
    %cst_16 = arith.constant dense<0.000000e+00> : vector<2x2xf32>
    %22 = tpu.matmul %20, %21, %cst_16 {dimension_numbers = #tpu.dot_dimension_numbers<[1], [0], [0], [1], [0, 0, 1, 1], [], []>} : vector<2x90xf32>, vector<90x2xf32>, vector<2x2xf32> -> vector<2x2xf32>
    %c0_17 = arith.constant 0 : index
    %c0_18 = arith.constant 0 : index
    %23 = vector.load %arg7[%c0_17, %c0_18] : memref<1x2xf32, #tpu.memory_space<vmem>>, vector<1x2xf32>
    %24 = vector.broadcast %23 : vector<1x2xf32> to vector<2x2xf32>
    %25 = arith.addf %22, %24 : vector<2x2xf32>
    %c0_19 = arith.constant 0 : index
    %c0_20 = arith.constant 0 : index
    %26 = vector.load %arg8[%c0_19, %c0_20] : memref<2x2xf32, #tpu.memory_space<vmem>>, vector<2x2xf32>
    tpu.vector_store %arg8[%c0_19, %c0_20], %25 {strides = array<i32>} : memref<2x2xf32, #tpu.memory_space<vmem>>, vector<2x2xf32>,
    return
  }
  func.func @transform_0(%arg0: i32) -> (i32, i32) {
    %c0_i32 = arith.constant 0 : i32
    %c0_i32_0 = arith.constant 0 : i32
    return %arg0, %c0_i32 : i32, i32
  }
  func.func @transform_1(%arg0: i32) -> (i32, i32) {
    %c0_i32 = arith.constant 0 : i32
    %c0_i32_0 = arith.constant 0 : i32
    %c0_i32_1 = arith.constant 0 : i32
    return %c0_i32, %c0_i32_0 : i32, i32
  }
  func.func @transform_2(%arg0: i32) -> (i32, i32) {
    %c0_i32 = arith.constant 0 : i32
    %c0_i32_0 = arith.constant 0 : i32
    %c0_i32_1 = arith.constant 0 : i32
    return %c0_i32, %c0_i32_0 : i32, i32
  }
  func.func @transform_3(%arg0: i32) -> (i32, i32) {
    %c0_i32 = arith.constant 0 : i32
    %c0_i32_0 = arith.constant 0 : i32
    %c0_i32_1 = arith.constant 0 : i32
    return %c0_i32, %c0_i32_0 : i32, i32
  }
  func.func @transform_4(%arg0: i32) -> (i32, i32) {
    %c0_i32 = arith.constant 0 : i32
    %c0_i32_0 = arith.constant 0 : i32
    %c0_i32_1 = arith.constant 0 : i32
    return %c0_i32, %c0_i32_0 : i32, i32
  }
  func.func @transform_5(%arg0: i32) -> (i32, i32) {
    %c0_i32 = arith.constant 0 : i32
    %c0_i32_0 = arith.constant 0 : i32
    %c0_i32_1 = arith.constant 0 : i32
    return %c0_i32, %c0_i32_0 : i32, i32
  }
  func.func @transform_6(%arg0: i32) -> (i32, i32) {
    %c0_i32 = arith.constant 0 : i32
    %c0_i32_0 = arith.constant 0 : i32
    %c0_i32_1 = arith.constant 0 : i32
    return %c0_i32, %c0_i32_0 : i32, i32
  }
  func.func @transform_7(%arg0: i32) -> (i32, i32) {
    %c0_i32 = arith.constant 0 : i32
    %c0_i32_0 = arith.constant 0 : i32
    return %arg0, %c0_i32 : i32, i32
  }
}

</mosaic_0001>

<bundles_post_ra>
// kernel: tpu_custom_call.1
= control target key start
LH: loop header
LB: loop body
LE: loop exit
PB: predicated region body
PF: predicated region fallthrough
CT: control target
= control target key end

     0   :  { %12 = vsyncpa [#allocation3], 0  ;;  %s1188_s0 = inlined_call_operand.vmem [shape: f32[2,6144], index: 0, kind: input, shape index: {}]   ;;  %s1189_s1 = inlined_call_operand.hbm [shape: f32[768,128], index: 1, kind: input, shape index: {}]   ;;  %s1190_s2 = inlined_call_operand.vmem [shape: f32[1,128], index: 2, kind: input, shape index: {}]   ;;  %s1191_s3 = inlined_call_operand.vmem [shape: f32[128,90], index: 3, kind: input, shape index: {}]   ;;  %s1192_s4 = inlined_call_operand.vmem [shape: f32[1,90], index: 4, kind: input, shape index: {}]   ;;  %s1193_s5 = inlined_call_operand.vmem [shape: f32[90,2], index: 5, kind: input, shape index: {}]   ;;  %s1194_s6 = inlined_call_operand.vmem [shape: f32[1,2], index: 6, kind: input, shape index: {}]   ;;  %s1195_s7 = inlined_call_operand.hbm [shape: f32[2,2], index: 7, kind: output, shape index: {}]  }
   0x1   :  { %13 = vsyncpa [#allocation4], 0  ;;  %s1002_s24 = smov [#allocation2]   ;;  %s954_s28 = scalar_lea.hbm %s1189_s1, 12288 }
   0x2   :  { %s21_s25 = sshll.u32 %s1002_s24, 4  ;;  %p955_p0 = scmp.ne.s32.totalorder %s1189_s1, %s954_s28  ;;  %s22_s25 = int_to_ptr.vmem [resolvable:$true] %s21_s25 }
   0x3   :  { %p958_p1 = scmp.lt.u32.totalorder %s954_s28, %s1189_s1 }
   0x5   :  { %p960_p2 = pnand %p958_p1, %p955_p0 }
   0x7   :  { %963 = shalt.err (!%p960_p2)
}
   0x8   :  { %s964_s10 = scalar_lea.vmem %s22_s25, 12288  ;;  %p969_p4 = scmp.lt.s32.totalorder %s22_s25, %s22_s25 }
   0x9   :  { %p965_p3 = scmp.ne.s32.totalorder %s22_s25, %s964_s10  ;;  %p970_p5 = scmp.lt.s32.totalorder %s964_s10, %s964_s10 }
   0xb   :  { %p971_p6 = por %p970_p5, %p969_p4 }
   0xd   :  { %p972_p7 = pnand %p971_p6, %p965_p3 }
   0xf   :  { %975 = shalt.err (!%p972_p7)
}
  0x10   :  { %s1003_s11 = smov 128   ;;  %s1004_s12 = smov 8  }
  0x11   :  { %27 = dma.hbm_to_vmem [thread:$0]  %s1189_s1, 12288, %s22_s25, [#allocation3], %s1003_s11, %s1003_s11, %s1004_s12  }
  0x12   :  { %998 = dma.done.wait [#allocation3], 12288  }
  0x13   :  { %999 = vsyncadd [#allocation3], 4294955008  ;;  %v59_v0 = vld [vmem:[#allocation2 + $0x80] sm:$0xff]  ;;  %v60_v1 = vld [vmem:[#allocation2 + $0x88] sm:$0xff]  ;;  %v1005_v43 = vmov 1983009808   ;;  %v152_v45 = vlaneseq }
  0x14   :  { %v43_v2 = vld [vmem:[#allocation2] sm:$0xff]  ;;  %v805_v3 = vpack.c.bf16 %v60_v1, %v59_v0  ;;  %v44_v4 = vld [vmem:[#allocation2 + $0x8] sm:$0xff]  ;;  %v61_v11 = vld [vmem:[#allocation2 + $0x90] sm:$0xff]  ;;  %v150_v44 = vunpack.c.l.s4 %v1005_v43  ;;  %vm1007_vm0 = vmmov 0   ;;  %vm511_vm2 = vcmask 1041408  }
  0x15   :  { %v91_v5 = vld [vmem:[#allocation2 + $0x180] sm:$0xff]  ;;  %v92_v6 = vld [vmem:[#allocation2 + $0x188] sm:$0xff]  ;;  %v807_v7 = vpack.c.bf16 %v44_v4, %v43_v2  ;;  %v62_v13 = vld [vmem:[#allocation2 + $0x98] sm:$0xff]  ;;  %v153_v60 = vshrl.u32 %v152_v45, 7  ;;  %vm1009_vm3 = vmmov 1   ;;  %vm507_vm6 = vcmask 736256  }
  0x16   :  { %v837_v8 = vpack.c.bf16 %v92_v6, %v91_v5  ;;  %v75_v9 = vld [vmem:[#allocation2 + $0x100] sm:$0xff]  ;;  %v76_v10 = vld [vmem:[#allocation2 + $0x108] sm:$0xff]  ;;  %806 = vmatprep.subr.bf16.mxu0 %v805_v3  ;;  %v45_v14 = vld [vmem:[#allocation2 + $0x10] sm:$0xff]  ;;  %v809_v16 = vpack.c.bf16 %v62_v13, %v61_v11  ;;  %v151_v59 = vunpack.c.0.s8 %v150_v44  ;;  %vm585_vm7 = vcmask 9216  }
  0x17   :  { %v839_v12 = vpack.c.bf16 %v76_v10, %v75_v9  ;;  %v46_v15 = vld [vmem:[#allocation2 + $0x18] sm:$0xff]  ;;  %808 = vmatpush3.bf16.msra.mxu0 %v807_v7  ;;  %v93_v18 = vld [vmem:[#allocation2 + $0x190] sm:$0xff]  ;;  %v63_v23 = vld [vmem:[#allocation2 + $0xa0] sm:$0xff] }
  0x18   :  { %838 = vmatprep.subr.bf16.mxu1 %v837_v8  ;;  %v811_v17 = vpack.c.bf16 %v46_v15, %v45_v14  ;;  %v94_v19 = vld [vmem:[#allocation2 + $0x198] sm:$0xff]  ;;  %v77_v20 = vld [vmem:[#allocation2 + $0x110] sm:$0xff]  ;;  %v64_v24 = vld [vmem:[#allocation2 + $0xa8] sm:$0xff]  ;;  %810 = vmatprep.subr.bf16.mxu0 %v809_v16  ;;  %v154_v10 = vsub.s32 %v151_v59, %v153_v60 }
  0x19   :  { %840 = vmatpush3.bf16.msra.mxu1 %v839_v12  ;;  %v841_v21 = vpack.c.bf16 %v94_v19, %v93_v18  ;;  %v78_v22 = vld [vmem:[#allocation2 + $0x118] sm:$0xff]  ;;  %v813_v26 = vpack.c.bf16 %v64_v24, %v63_v23  ;;  %v47_v27 = vld [vmem:[#allocation2 + $0x20] sm:$0xff]  ;;  %v48_v28 = vld [vmem:[#allocation2 + $0x28] sm:$0xff] }
  0x1a   :  { %v843_v25 = vpack.c.bf16 %v78_v22, %v77_v20  ;;  %v95_v29 = vld [vmem:[#allocation2 + $0x1a0] sm:$0xff]  ;;  %v96_v30 = vld [vmem:[#allocation2 + $0x1a8] sm:$0xff]  ;;  %v815_v33 = vpack.c.bf16 %v48_v28, %v47_v27  ;;  %v65_v35 = vld [vmem:[#allocation2 + $0xb0] sm:$0xff] }
  0x1b   :  { %842 = vmatprep.subr.bf16.mxu1 %v841_v21  ;;  %v79_v31 = vld [vmem:[#allocation2 + $0x120] sm:$0xff]  ;;  %v80_v32 = vld [vmem:[#allocation2 + $0x128] sm:$0xff]  ;;  %812 = vmatpush3.bf16.msra.mxu0 %v811_v17  ;;  %v845_v34 = vpack.c.bf16 %v96_v30, %v95_v29  ;;  %v66_v36 = vld [vmem:[#allocation2 + $0xb8] sm:$0xff] }
  0x1c   :  { %v49_v37 = vld [vmem:[#allocation2 + $0x30] sm:$0xff]  ;;  %814 = vmatprep.subr.bf16.mxu0 %v813_v26  ;;  %v847_v38 = vpack.c.bf16 %v80_v32, %v79_v31  ;;  %v817_v39 = vpack.c.bf16 %v66_v36, %v65_v35  ;;  %v50_v40 = vld [vmem:[#allocation2 + $0x38] sm:$0xff]  ;;  %v67_v49 = vld [vmem:[#allocation2 + $0xc0] sm:$0xff] }
  0x1d   :  { %844 = vmatpush3.bf16.msra.mxu1 %v843_v25  ;;  %v97_v41 = vld [vmem:[#allocation2 + $0x1b0] sm:$0xff]  ;;  %v98_v42 = vld [vmem:[#allocation2 + $0x1b8] sm:$0xff]  ;;  %v68_v50 = vld [vmem:[#allocation2 + $0xc8] sm:$0xff]  ;;  %v819_v51 = vpack.c.bf16 %v50_v40, %v49_v37 }
  0x1e   :  { %846 = vmatprep.subr.bf16.mxu1 %v845_v34  ;;  %v849_v46 = vpack.c.bf16 %v98_v42, %v97_v41  ;;  %v81_v47 = vld [vmem:[#allocation2 + $0x130] sm:$0xff]  ;;  %v82_v48 = vld [vmem:[#allocation2 + $0x138] sm:$0xff]  ;;  %v99_v52 = vld [vmem:[#allocation2 + $0x1c0] sm:$0xff]  ;;  %v821_v55 = vpack.c.bf16 %v68_v50, %v67_v49 }
  0x1f   :  { %816 = vmatpush3.bf16.msra.mxu0 %v815_v33  ;;  %v100_v53 = vld [vmem:[#allocation2 + $0x1c8] sm:$0xff]  ;;  %v851_v54 = vpack.c.bf16 %v82_v48, %v81_v47  ;;  %v51_v56 = vld [vmem:[#allocation2 + $0x40] sm:$0xff]  ;;  %v69_v63 = vld [vmem:[#allocation2 + $0xd0] sm:$0xff] }
  0x20   :  { %818 = vmatprep.subr.bf16.mxu0 %v817_v39  ;;  %v52_v57 = vld [vmem:[#allocation2 + $0x48] sm:$0xff]  ;;  %v83_v58 = vld [vmem:[#allocation2 + $0x140] sm:$0xff]  ;;  %v853_v61 = vpack.c.bf16 %v100_v53, %v99_v52  ;;  %v70_v0 = vld [vmem:[#allocation2 + $0xd8] sm:$0xff] }
  0x21   :  { %848 = vmatpush3.bf16.msra.mxu1 %v847_v38  ;;  %v84_v62 = vld [vmem:[#allocation2 + $0x148] sm:$0xff]  ;;  %v101_v1 = vld [vmem:[#allocation2 + $0x1d0] sm:$0xff]  ;;  %v102_v2 = vld [vmem:[#allocation2 + $0x1d8] sm:$0xff]  ;;  %v823_v3 = vpack.c.bf16 %v52_v57, %v51_v56  ;;  %v825_v6 = vpack.c.bf16 %v70_v0, %v69_v63 }
  0x22   :  { %850 = vmatprep.subr.bf16.mxu1 %v849_v46  ;;  %v53_v4 = vld [vmem:[#allocation2 + $0x50] sm:$0xff]  ;;  %v855_v5 = vpack.c.bf16 %v84_v62, %v83_v58  ;;  %v54_v7 = vld [vmem:[#allocation2 + $0x58] sm:$0xff]  ;;  %v857_v11 = vpack.c.bf16 %v102_v2, %v101_v1  ;;  %v71_v12 = vld [vmem:[#allocation2 + $0xe0] sm:$0xff] }
  0x23   :  { %820 = vmatpush3.bf16.msra.mxu0 %v819_v51  ;;  %v85_v8 = vld [vmem:[#allocation2 + $0x150] sm:$0xff]  ;;  %v86_v9 = vld [vmem:[#allocation2 + $0x158] sm:$0xff]  ;;  %v72_v13 = vld [vmem:[#allocation2 + $0xe8] sm:$0xff]  ;;  %v827_v16 = vpack.c.bf16 %v54_v7, %v53_v4 }
  0x24   :  { %822 = vmatprep.subr.bf16.mxu0 %v821_v55  ;;  %v103_v14 = vld [vmem:[#allocation2 + $0x1e0] sm:$0xff]  ;;  %v104_v15 = vld [vmem:[#allocation2 + $0x1e8] sm:$0xff]  ;;  %v859_v17 = vpack.c.bf16 %v86_v9, %v85_v8  ;;  %v829_v19 = vpack.c.bf16 %v72_v13, %v71_v12  ;;  %v73_v27 = vld [vmem:[#allocation2 + $0xf0] sm:$0xff] }
  0x25   :  { %852 = vmatpush3.bf16.msra.mxu1 %v851_v54  ;;  %v41_v18 = vld [vmem:[%s1188_s0] sm:$0xff]  ;;  %v56_v21 = vld [vmem:[#allocation2 + $0x68] sm:$0xff]  ;;  %v861_v25 = vpack.c.bf16 %v104_v15, %v103_v14  ;;  %v74_v28 = vld [vmem:[#allocation2 + $0xf8] sm:$0xff] }
  0x26   :  { %854 = vmatprep.subr.bf16.mxu1 %v853_v61  ;;  %v55_v20 = vld [vmem:[#allocation2 + $0x60] sm:$0xff]  ;;  %v155_v23 = vrot.slane %v41_v18, %v154_v10  ;;  %v148_v24 = vcombine.high %v41_v18, %v41_v18  ;;  %v88_v26 = vld [vmem:[#allocation2 + $0x168] sm:$0xff]  ;;  %v105_v29 = vld [vmem:[#allocation2 + $0x1f0] sm:$0xff]  ;;  %v833_v35 = vpack.c.bf16 %v74_v28, %v73_v27 }
  0x27   :  { %824 = vmatpush3.bf16.msra.mxu0 %v823_v3  ;;  %v87_v22 = vld [vmem:[#allocation2 + $0x160] sm:$0xff]  ;;  %v106_v30 = vld [vmem:[#allocation2 + $0x1f8] sm:$0xff]  ;;  %v831_v33 = vpack.c.bf16 %v56_v21, %v55_v20  ;;  %v57_v36 = vld [vmem:[#allocation2 + $0x70] sm:$0xff] }
  0x28   :  { %826 = vmatprep.subr.bf16.mxu0 %v825_v6  ;;  %v163_v31 = vcombine.high %v155_v23, %v155_v23  ;;  %v162_v32 = vrot.slane %v148_v24, %v154_v10  ;;  %v863_v34 = vpack.c.bf16 %v88_v26, %v87_v22  ;;  %v58_v37 = vld [vmem:[#allocation2 + $0x78] sm:$0xff]  ;;  %v89_v38 = vld [vmem:[#allocation2 + $0x170] sm:$0xff]  ;;  %v865_v40 = vpack.c.bf16 %v106_v30, %v105_v29  ;;  %v123_v42 = vld [vmem:[#allocation2 + $0x280] sm:$0xff] }
  0x29   :  { %856 = vmatpush3.bf16.msra.mxu1 %v855_v5  ;;  %v90_v41 = vld [vmem:[#allocation2 + $0x178] sm:$0xff]  ;;  %v124_v43 = vld [vmem:[#allocation2 + $0x288] sm:$0xff]  ;;  %v835_v44 = vpack.c.bf16 %v58_v37, %v57_v36  ;;  %v107_v47 = vld [vmem:[#allocation2 + $0x200] sm:$0xff] }
  0x2a   :  { %858 = vmatprep.subr.bf16.mxu1 %v857_v11  ;;  %v164_v39 = vcombine.high %v162_v32, %v162_v32  ;;  %243 = vmatprep.mubr.f32.mxu0 %v163_v31  ;;  %v867_v45 = vpack.c.bf16 %v90_v41, %v89_v38  ;;  %v869_v46 = vpack.c.bf16 %v124_v43, %v123_v42  ;;  %v108_v48 = vld [vmem:[#allocation2 + $0x208] sm:$0xff]  ;;  %v125_v49 = vld [vmem:[#allocation2 + $0x290] sm:$0xff]  ;;  %v126_v50 = vld [vmem:[#allocation2 + $0x298] sm:$0xff] }
  0x2b   :  { %828 = vmatpush3.bf16.msra.mxu0 %v827_v16  ;;  %v871_v51 = vpack.c.bf16 %v108_v48, %v107_v47  ;;  %v603_v52 = vld.sshfl [vmem:[%s1188_s0 + $0x8] sm:$0x33 pattern:$0x76325410]  ;;  %v873_v53 = vpack.c.bf16 %v126_v50, %v125_v49  ;;  %v109_v54 = vld [vmem:[#allocation2 + $0x210] sm:$0xff]  ;;  %v110_v55 = vld [vmem:[#allocation2 + $0x218] sm:$0xff] }
  0x2c   :  { %830 = vmatprep.subr.bf16.mxu0 %v829_v19  ;;  %313 = vmatprep.mubr.f32.mxu1 %v164_v39  ;;  %v172_v56 = vcombine.high %v603_v52, %v603_v52  ;;  %v127_v57 = vld [vmem:[#allocation2 + $0x2a0] sm:$0xff]  ;;  %v128_v58 = vld [vmem:[#allocation2 + $0x2a8] sm:$0xff]  ;;  %v875_v59 = vpack.c.bf16 %v110_v55, %v109_v54  ;;  %v129_v63 = vld [vmem:[#allocation2 + $0x2b0] sm:$0xff]  ;;  %v1008_v55 = vmov 0.0  }
  0x2d   :  { %860 = vmatpush3.bf16.msra.mxu1 %v859_v17  ;;  %v877_v60 = vpack.c.bf16 %v128_v58, %v127_v57  ;;  %v111_v61 = vld [vmem:[#allocation2 + $0x220] sm:$0xff]  ;;  %v112_v62 = vld [vmem:[#allocation2 + $0x228] sm:$0xff]  ;;  %v130_v0 = vld [vmem:[#allocation2 + $0x2b8] sm:$0xff] }
  0x2e   :  { %862 = vmatprep.subr.bf16.mxu1 %v861_v25  ;;  %v879_v1 = vpack.c.bf16 %v112_v62, %v111_v61  ;;  %v881_v2 = vpack.c.bf16 %v130_v0, %v129_v63  ;;  %v113_v3 = vld [vmem:[#allocation2 + $0x230] sm:$0xff]  ;;  %v114_v4 = vld [vmem:[#allocation2 + $0x238] sm:$0xff]  ;;  %v131_v5 = vld [vmem:[#allocation2 + $0x2c0] sm:$0xff] }
  0x2f   :  { %832 = vmatpush3.bf16.msra.mxu0 %v831_v33  ;;  %v132_v6 = vld [vmem:[#allocation2 + $0x2c8] sm:$0xff]  ;;  %v883_v7 = vpack.c.bf16 %v114_v4, %v113_v3  ;;  %v115_v9 = vld [vmem:[#allocation2 + $0x240] sm:$0xff]  ;;  %v133_v11 = vld [vmem:[#allocation2 + $0x2d0] sm:$0xff]  ;;  %v1006_v33 = vmov 0.0|0.0  }
  0x30   :  { %834 = vmatprep.subr.bf16.mxu0 %v833_v35  ;;  %v885_v8 = vpack.c.bf16 %v132_v6, %v131_v5  ;;  %v116_v10 = vld [vmem:[#allocation2 + $0x248] sm:$0xff]  ;;  %v134_v12 = vld [vmem:[#allocation2 + $0x2d8] sm:$0xff]  ;;  %v117_v15 = vld [vmem:[#allocation2 + $0x250] sm:$0xff] }
  0x31   :  { %864 = vmatpush3.bf16.msra.mxu1 %v863_v34  ;;  %v887_v13 = vpack.c.bf16 %v116_v10, %v115_v9  ;;  %v889_v14 = vpack.c.bf16 %v134_v12, %v133_v11  ;;  %v118_v16 = vld [vmem:[#allocation2 + $0x258] sm:$0xff]  ;;  %v135_v17 = vld [vmem:[#allocation2 + $0x2e0] sm:$0xff]  ;;  %v136_v18 = vld [vmem:[#allocation2 + $0x2e8] sm:$0xff] }
  0x32   :  { %866 = vmatprep.subr.bf16.mxu1 %v865_v40  ;;  %v891_v19 = vpack.c.bf16 %v118_v16, %v117_v15  ;;  %v893_v20 = vpack.c.bf16 %v136_v18, %v135_v17  ;;  %v119_v21 = vld [vmem:[#allocation2 + $0x260] sm:$0xff]  ;;  %v120_v22 = vld [vmem:[#allocation2 + $0x268] sm:$0xff]  ;;  %v138_v24 = vld [vmem:[#allocation2 + $0x2f8] sm:$0xff] }
  0x33   :  { %836 = vmatpush3.bf16.msra.mxu0 %v835_v44  ;;  %v895_v25 = vpack.c.bf16 %v120_v22, %v119_v21  ;;  %v121_v27 = vld [vmem:[#allocation2 + $0x270] sm:$0xff]  ;;  %v122_v28 = vld [vmem:[#allocation2 + $0x278] sm:$0xff]  ;;  %v392_v30 = vld [vmem:[%s1191_s3] sm:$0xff] }
  0x34   :  { %870 = vmatprep.subr.bf16.mxu0 %v869_v46  ;;  %v899_v29 = vpack.c.bf16 %v122_v28, %v121_v27  ;;  %v393_v31 = vld [vmem:[%s1191_s3 + $0x8] sm:$0xff]  ;;  %v395_v35 = vld [vmem:[%s1191_s3 + $0x18] sm:$0xff]  ;;  %v396_v37 = vld [vmem:[%s1191_s3 + $0x20] sm:$0xff] }
  0x35   :  { %868 = vmatpush3.bf16.msra.mxu1 %v867_v45  ;;  %v902_v34 = vpack.c.bf16 %v393_v31, %v392_v30  ;;  %v397_v38 = vld [vmem:[%s1191_s3 + $0x28] sm:$0xff]  ;;  %v398_v40 = vld [vmem:[%s1191_s3 + $0x30] sm:$0xff]  ;;  %v399_v41 = vld [vmem:[%s1191_s3 + $0x38] sm:$0xff] }
  0x36   :  { %244 = vmatmul.mubr.f32.vlgmr.msra.gmra.mrb[0].mxu0 %v155_v23  ;;  %v137_v23 = vld [vmem:[#allocation2 + $0x2f0] sm:$0xff]  ;;  %901 = vmatprep.subr.bf16.mxu1 %v1006_v33  ;;  %v908_v39 = vpack.c.bf16 %v397_v38, %v396_v37  ;;  %v911_v42 = vpack.c.bf16 %v399_v41, %v398_v40  ;;  %v400_v43 = vld [vmem:[%s1191_s3 + $0x40] sm:$0xff]  ;;  %v401_v44 = vld [vmem:[%s1191_s3 + $0x48] sm:$0xff] }
  0x37   :  { %872 = vmatpush3.bf16.msra.mxu0 %v871_v51  ;;  %383 = vmatprep.mubr.f32.mxu0 %v172_v56  ;;  %v897_v26 = vpack.c.bf16 %v138_v24, %v137_v23  ;;  %v914_v45 = vpack.c.bf16 %v401_v44, %v400_v43  ;;  %v402_v46 = vld [vmem:[%s1191_s3 + $0x50] sm:$0xff]  ;;  %v403_v47 = vld [vmem:[%s1191_s3 + $0x58] sm:$0xff]  ;;  %v404_v49 = vld [vmem:[%s1191_s3 + $0x60] sm:$0xff] }
  0x38   :  { %314 = vmatmul.mubr.f32.vlgmr.msra.gmra.mrb[0].mxu1 %v162_v32  ;;  %874 = vmatprep.subr.bf16.mxu0 %v873_v53  ;;  %v394_v32 = vld [vmem:[%s1191_s3 + $0x10] sm:$0xff]  ;;  %v917_v48 = vpack.c.bf16 %v403_v47, %v402_v46  ;;  %v405_v50 = vld [vmem:[%s1191_s3 + $0x68] sm:$0xff]  ;;  %v407_v53 = vld [vmem:[%s1191_s3 + $0x78] sm:$0xff] }
  0x39   :  { %903 = vmatpush3.bf16.msra.mxu1 %v902_v34  ;;  %v905_v36 = vpack.c.bf16 %v395_v35, %v394_v32  ;;  %v920_v51 = vpack.c.bf16 %v405_v50, %v404_v49  ;;  %775 = vmatprep.mubr.msk.f32.mxu1 %vm1007_vm0, %v1008_v55  ;;  %v488_v56 = vld [vmem:[%s1193_s5] sm:$0xff]  ;;  %v489_v57 = vld [vmem:[%s1193_s5 + $0x8] sm:$0xff]  ;;  %v490_v58 = vld [vmem:[%s1193_s5 + $0x10] sm:$0xff] }
  0x3a   :  { %904 = vmatprep.subr.bf16.mxu1 %v1006_v33  ;;  %v492_v62 = vld [vmem:[%s1193_s5 + $0x20] sm:$0xff]  ;;  %v493_v63 = vld [vmem:[%s1193_s5 + $0x28] sm:$0xff]  ;;  %v498_v22 = vld [vmem:[%s1193_s5 + $0x50] sm:$0xff] }
  0x3b   :  { %876 = vmatpush3.bf16.msra.mxu0 %v875_v59  ;;  %v926_v59 = vpack.c.bf16 %v489_v57, %v488_v56  ;;  %v932_v0 = vpack.c.bf16 %v493_v63, %v492_v62  ;;  %v496_v4 = vld [vmem:[%s1193_s5 + $0x40] sm:$0xff]  ;;  %v497_v5 = vld [vmem:[%s1193_s5 + $0x48] sm:$0xff]  ;;  %v499_v23 = vld [vmem:[%s1193_s5 + $0x58] sm:$0x3] }
  0x3c   :  { %878 = vmatprep.subr.bf16.mxu0 %v877_v60  ;;  %v491_v60 = vld [vmem:[%s1193_s5 + $0x18] sm:$0xff]  ;;  %v938_v6 = vpack.c.bf16 %v497_v5, %v496_v4  ;;  %v941_v24 = vpack.c.bf16 %v499_v23, %v498_v22  ;;  %vm942_vm4 = vmpackc.low %vm511_vm2, %vm1009_vm3  ;;  %v605_v31 = vld [vmem:[%s1194_s6] ss:$0 sm:$0xff] }
  0x3d   :  { %906 = vmatpush3.bf16.msra.mxu1 %v905_v36  ;;  %v929_v61 = vpack.c.bf16 %v491_v60, %v490_v58 }
  0x3e   :  { %907 = vmatprep.subr.bf16.mxu1 %v1006_v33 }
  0x3f   :  { %880 = vmatpush3.bf16.msra.mxu0 %v879_v1  ;;  %v494_v1 = vld [vmem:[%s1193_s5 + $0x30] sm:$0xff] }
  0x40   :  { %882 = vmatprep.subr.bf16.mxu0 %v881_v2  ;;  %v495_v2 = vld [vmem:[%s1193_s5 + $0x38] sm:$0xff]  ;;  %s1010_s5 = smov [#allocation5]  }
  0x41   :  { %909 = vmatpush3.bf16.msra.mxu1 %v908_v39  ;;  %v935_v3 = vpack.c.bf16 %v495_v2, %v494_v1  ;;  %s593_s27 = sshll.u32 %s1010_s5, 4  ;;  %s594_s27 = int_to_ptr.vmem [resolvable:$true] %s593_s27 }
  0x42   :  { %910 = vmatprep.subr.bf16.mxu1 %v1006_v33  ;;  %p981_p9 = scmp.lt.s32.totalorder %s594_s27, %s594_s27 }
  0x43   :  { %884 = vmatpush3.bf16.msra.mxu0 %v883_v7 }
  0x44   :  { %886 = vmatprep.subr.bf16.mxu0 %v885_v8  ;;  %v602_v8 = vld [vmem:[%s1190_s2] ss:$0 sm:$0xff] }
  0x45   :  { %912 = vmatpush3.bf16.msra.mxu1 %v911_v42 }
  0x46   :  { %913 = vmatprep.subr.bf16.mxu1 %v1006_v33 }
  0x47   :  { %888 = vmatpush3.bf16.msra.mxu0 %v887_v13 }
  0x48   :  { %890 = vmatprep.subr.bf16.mxu0 %v889_v14 }
  0x49   :  { %915 = vmatpush3.bf16.msra.mxu1 %v914_v45 }
  0x4a   :  { %916 = vmatprep.subr.bf16.mxu1 %v1006_v33 }
  0x4b   :  { %892 = vmatpush3.bf16.msra.mxu0 %v891_v19 }
  0x4c   :  { %894 = vmatprep.subr.bf16.mxu0 %v893_v20 }
  0x4d   :  { %918 = vmatpush3.bf16.msra.mxu1 %v917_v48 }
  0x4e   :  { %919 = vmatprep.subr.bf16.mxu1 %v1006_v33 }
  0x4f   :  { %896 = vmatpush3.bf16.msra.mxu0 %v895_v25  ;;  %v604_v25 = vld [vmem:[%s1192_s4] ss:$0 sm:$0xff]  ;;  %s976_s4 = scalar_lea.vmem %s594_s27, 32 }
  0x50   :  { %898 = vmatprep.subr.bf16.mxu0 %v897_v26  ;;  %p977_p8 = scmp.ne.s32.totalorder %s594_s27, %s976_s4  ;;  %p982_p10 = scmp.lt.s32.totalorder %s976_s4, %s976_s4 }
  0x51   :  { %921 = vmatpush3.bf16.msra.mxu1 %v920_v51 }
  0x52   :  { %922 = vmatprep.subr.bf16.mxu1 %v1006_v33  ;;  %p983_p11 = por %p982_p10, %p981_p9 }
  0x53   :  { %900 = vmatpush3.bf16.msra.mxu0 %v899_v29 }
  0x54   :  { %925 = vmatprep.subr.bf16.mxu0 %v1006_v33  ;;  %p984_p12 = pnand %p983_p11, %p977_p8 }
  0x56   :  { %384 = vmatmul.mubr.f32.vlgmr.msra.gmra.mrb[2].mxu0 %v603_v52  ;;  %v406_v52 = vld [vmem:[%s1191_s3 + $0x70] sm:$0xff] }
  0x57   :  { %v923_v54 = vpack.c.bf16 %v407_v53, %v406_v52  ;;  %802 = vmatprep.mubr.msk.f32.mxu0 %vm1007_vm0, %v1008_v55  ;;  %927 = vmatpush3.bf16.msra.mxu0 %v926_v59 }
  0x58   :  { %928 = vmatprep.subr.bf16.mxu0 %v1006_v33 }
  0x59   :  { %924 = vmatpush3.bf16.msra.mxu1 %v923_v54 }
  0x5b   :  { %930 = vmatpush3.bf16.msra.mxu0 %v929_v61 }
  0x5c   :  { %931 = vmatprep.subr.bf16.mxu0 %v1006_v33 }
  0x5f   :  { %933 = vmatpush3.bf16.msra.mxu0 %v932_v0 }
  0x60   :  { %934 = vmatprep.subr.bf16.mxu0 %v1006_v33 }
  0x63   :  { %936 = vmatpush3.bf16.msra.mxu0 %v935_v3 }
  0x64   :  { %937 = vmatprep.subr.bf16.mxu0 %v1006_v33 }
  0x67   :  { %939 = vmatpush3.bf16.msra.mxu0 %v938_v6 }
  0x68   :  { %940 = vmatprep.subr.bf16.mxu0 %v1006_v33 }
  0x6b   :  { %943 = vmatpush3.bf16.msk.msra.mxu0 %vm942_vm4, %v941_v24 }
 0x109   :  { %v640_v7 = vpop.f32.mrb[0].mxu0 }
 0x10a   :  { %v641_v9 = vpop.f32.mrb[1].mxu0 }
 0x10b   :  { %v675_v10 = vpop.f32.mrb[0].mxu1  ;;  %v642_v11 = vadd.f32 %v641_v9, %v640_v7 }
 0x10c   :  { %v676_v12 = vpop.f32.mrb[1].mxu1 }
 0x10d   :  { %v677_v13 = vadd.f32 %v676_v12, %v675_v10  ;;  %v246_v14 = vadd.f32 %v642_v11, %v602_v8 }
 0x10f   :  { %v316_v15 = vadd.f32 %v677_v13, %v246_v14 }
 0x129   :  { %v710_v16 = vpop.f32.mrb[2].mxu0 }
 0x12a   :  { %v711_v17 = vpop.f32.mrb[3].mxu0 }
 0x12b   :  { %v712_v18 = vadd.f32 %v711_v17, %v710_v16 }
 0x12d   :  { %v386_v19 = vadd.f32 %v712_v18, %v316_v15 }
 0x12f   :  { %v390_v20 = vmul.f32 0.01, %v386_v19  ;;  %vm389_vm1 = vcmp.gt.f32.partialorder %v386_v19, 0.0 }
 0x131   :  { %v391_v21 = vsel %vm389_vm1, %v386_v19, %v390_v20 }
 0x132   :  { %776 = vmatmul.mubr.f32.vlgmr.msra.gmra.mrb[2].mxu1 %v391_v21 }
 0x205   :  { %v481_v26 = vpop.f32.mrb[2].mxu1 }
 0x206   :  { %v482_v27 = vadd.f32 %v604_v25, %v481_v26  ;;  %v777_v28 = vpop.f32.mrb[3].mxu1 }
 0x208   :  { %vm485_vm5 = vcmp.gt.f32.partialorder %v482_v27, 0.0  ;;  %v486_v29 = vmul.f32 0.01, %v482_v27 }
 0x20a   :  { %v487_v30 = vsel %vm485_vm5, %v482_v27, %v486_v29 }
 0x20b   :  { %803 = vmatmul.mubr.msk.f32.vlgmr.msra.gmra.mrb[4].mxu0 %vm507_vm6, %v487_v30 }
 0x2de   :  { %v581_v32 = vpop.f32.mrb[4].mxu0 }
 0x2df   :  { %v582_v33 = vadd.f32 %v605_v31, %v581_v32  ;;  %v804_v34 = vpop.f32.mrb[5].mxu0 }
 0x2e1   :  { %586 = vst.msk [vmem:[#allocation5] sm:$0x3] %vm585_vm7, %v582_v33 }
 0x2e2   :  { %987 = shalt.err (!%p984_p12)
}
 0x2e3   :  { %s988_s3 = scalar_lea.hbm %s1195_s7, 32 }
 0x2e4   :  { %p989_p13 = scmp.ne.s32.totalorder %s1195_s7, %s988_s3  ;;  %p992_p0 = scmp.lt.u32.totalorder %s988_s3, %s1195_s7 }
 0x2e6   :  { %p994_p1 = pnand %p992_p0, %p989_p13 }
 0x2e8   :  { %997 = shalt.err (!%p994_p1)
}
 0x2e9   :  { %596 = dma.vmem_to_hbm [thread:$0]  %s594_s27, 32, %s1195_s7, [#allocation4]  }
 0x2ea   :  { %1000 = dma.done.wait [#allocation4], 32  }
 0x2eb   :  { %1001 = vsyncadd [#allocation4], 4294967264 }
 0x2ec   :  { %600 = vsyncpa [#allocation3], 1 }
 0x2ed   :  { %601 = vsyncpa [#allocation4], 1 }

</bundles_post_ra>
